<compile_context>
chip_gen: v7x
topology: tpu7x:2x2x1
jax: 0.10.0
libtpu: 0.0.40
codegen_flags: <defaults>
</compile_context>

<pallas_src>
import functools

import jax
import jax.numpy as jnp
from jax.experimental import pallas as pl
from jax.experimental.pallas import tpu as pltpu

EPS = 1e-5


# --------------------------------------------------------------------------
# Pallas kernel: full SoftAttn forward for a block of Nb batch elements.
# --------------------------------------------------------------------------
def _soft_attn_kernel(sp_ref, x_ref, m1_ref, m2_ref,
                      w1t_ref, b1_ref, w2t_ref, b2_ref, wft_ref, bf_ref,
                      out_ref, *, epilogue_dtype):
    x = x_ref[...]                                           # (Nb, C, HW) bf16

    # Means accumulate in f32 (bf16 accumulation over C / HW loses precision).
    xm = jnp.mean(x, axis=1, dtype=jnp.float32)              # (Nb, HW)
    xc = jnp.mean(x, axis=2, dtype=jnp.float32)              # (Nb, C)

    # ---- spatial attention branch (channel-mean, shared across C) --------
    s = jnp.dot(xm.astype(jnp.bfloat16), m1_ref[...],
                preferred_element_type=jnp.float32)          # 3x3 s2 p1 conv (+BN)
    s = jnp.maximum(s + sp_ref[0], 0.0)                      # (Nb, H2*W2)
    up = jnp.dot(s.astype(jnp.bfloat16), m2_ref[...],
                 preferred_element_type=jnp.float32)         # bilinear upsample
    y_sp = jnp.maximum(sp_ref[1] * up + sp_ref[2], 0.0)      # 1x1 conv + BN + relu

    # ---- channel attention branch -----------------------------------------
    h = jnp.dot(xc.astype(jnp.bfloat16), w1t_ref[...],
                preferred_element_type=jnp.float32) + b1_ref[...]
    h = jnp.maximum(h, 0.0)                                  # (Nb, Cmid)
    y_ch = jnp.dot(h.astype(jnp.bfloat16), w2t_ref[...],
                   preferred_element_type=jnp.float32) + b2_ref[...]
    y_ch = jnp.maximum(y_ch, 0.0)                            # (Nb, C)

    # ---- rank-1 combine + final 1x1 conv + BN + relu + sigmoid ------------
    # Per sample y = y_ch (C,1) * y_sp (1,HW) is rank-1, hence
    #   Wf @ y = (Wf @ y_ch) * y_sp
    zc = jnp.dot(y_ch.astype(jnp.bfloat16), wft_ref[...],
                 preferred_element_type=jnp.float32)         # (Nb, C)

    ed = epilogue_dtype
    z = (zc.astype(ed)[:, :, None] * y_sp.astype(ed)[:, None, :]
         + bf_ref[...].astype(ed)[:, :, None])               # (Nb, C, HW)
    z = jnp.maximum(z, 0.0)
    out_ref[...] = jax.nn.sigmoid(z).astype(out_ref.dtype)


# --------------------------------------------------------------------------
# Glue: parameter folding + linear-operator construction.
# --------------------------------------------------------------------------
def _fold_bn(gamma, beta, mean, var):
    s = gamma / jnp.sqrt(var + EPS)
    return s, beta - s * mean


def _sel_matrix(in_len, out_len, dr):
    # A[r, i] = 1  iff  r == 2*i + dr - 1   (stride-2, pad-1 row/col selection)
    r = jnp.arange(in_len)[:, None]
    i = jnp.arange(out_len)[None, :]
    idx = 2 * i + dr - 1
    return ((r == idx) & (idx >= 0) & (idx < in_len)).astype(jnp.float32)


def _interp_matrix(out_len, in_len):
    # bilinear, align_corners=True
    i = jnp.arange(out_len, dtype=jnp.float32)
    src = i * (in_len - 1) / (out_len - 1)
    r0 = jnp.clip(jnp.floor(src).astype(jnp.int32), 0, in_len - 1)
    r1 = jnp.minimum(r0 + 1, in_len - 1)
    frac = src - r0.astype(jnp.float32)
    rows = jnp.arange(out_len)
    m = jnp.zeros((out_len, in_len), jnp.float32)
    m = m.at[rows, r0].add(1.0 - frac)
    m = m.at[rows, r1].add(frac)
    return m


def _largest_divisor_leq(n, cap):
    cap = max(1, min(cap, n))
    best, d = 1, 1
    while d * d <= n:
        if n % d == 0:
            if d <= cap:
                best = max(best, d)
            q = n // d
            if q <= cap:
                best = max(best, q)
        d += 1
    return best


def soft_attn_pallas(x_nchw, p, *, block_n=128,
                     epilogue_dtype=jnp.bfloat16,     # use jnp.float32 on v5e
                     out_dtype=jnp.bfloat16,
                     vmem_io_budget_bytes=24 << 20):
    N, C, H, W = x_nchw.shape
    Cmid = p["w_c1"].shape[0]
    H2 = (H - 1) // 2 + 1
    W2 = (W - 1) // 2 + 1
    assert (2 * H2, 2 * W2) == (H, W), "kernel assumes even H, W"
    HW, H2W2 = H * W, H2 * W2

    # --- fold BN into the convs -------------------------------------------
    s3, t3 = _fold_bn(*p["bn3"])
    w3f = p["w3"][0, 0] * s3[0]                      # (3, 3)
    b3f = s3[0] * p["b3"][0] + t3[0]                 # scalar

    ss2, ts2 = _fold_bn(*p["bn_s2"])
    a2 = ss2[0] * p["w_s2"][0, 0, 0, 0]
    c2 = ss2[0] * p["b_s2"][0] + ts2[0]

    s1, t1 = _fold_bn(*p["bn_c1"])
    w1f = p["w_c1"] * s1[:, None]                    # (Cmid, C)
    b1f = (s1 * p["b_c1"] + t1).reshape(1, Cmid)

    s2, t2 = _fold_bn(*p["bn_c2"])
    w2f = p["w_c2"] * s2[:, None]                    # (C, Cmid)
    b2f = (s2 * p["b_c2"] + t2).reshape(1, C)

    sf, tf = _fold_bn(*p["bn_f"])
    wff = p["w_f"] * sf[:, None]                     # (C, C)
    bff = (sf * p["b_f"] + tf).reshape(1, C)

    # --- conv3x3(stride2,pad1)+BN as a dense matrix on flattened spatial ---
    A = [_sel_matrix(H, H2, dr) for dr in range(3)]  # (H, H2)
    B = [_sel_matrix(W, W2, dc) for dc in range(3)]  # (W, W2)
    M1 = jnp.zeros((HW, H2W2), jnp.float32)
    for dr in range(3):
        for dc in range(3):
            M1 = M1 + w3f[dr, dc] * jnp.kron(A[dr], B[dc])

    # --- bilinear align_corners upsample as a dense matrix ------------------
    Ur = _interp_matrix(H, H2)                       # (H, H2)
    Uc = _interp_matrix(W, W2)                       # (W, W2)
    M2 = jnp.kron(Ur, Uc).T                          # (H2W2, HW)

    # --- bf16 matmul constants (dots keep f32 accumulation) -----------------
    bf16 = jnp.bfloat16
    M1 = M1.astype(bf16)
    M2 = M2.astype(bf16)
    w1t = w1f.T.astype(bf16)                         # (C, Cmid)
    w2t = w2f.T.astype(bf16)                         # (Cmid, C)
    wft = wff.T.astype(bf16)                         # (C, C)   zc = y_ch @ Wf^T
    b1f = b1f.astype(jnp.float32)
    b2f = b2f.astype(jnp.float32)
    bff = bff.astype(jnp.float32)

    sp = jnp.stack([b3f, a2, c2]).astype(jnp.float32)    # scalars -> SMEM

    # --- batch-block selection ----------------------------------------------
    # * bf16 in+out, double-buffered -> 4 * Nb * C * HW * 2 B must fit budget
    #   (24 MiB default keeps headroom on v7x's 64 MiB physical VMEM).
    # * G >= 2 whenever N >= 2 so "parallel" actually uses both v7x TCs.
    # * prefer a divisor of N so no padded copy of x is needed.
    nb_cap = max(1, vmem_io_budget_bytes // (4 * C * HW * 2))
    target = int(min(block_n, nb_cap, max(1, (N + 1) // 2)))
    Nb = _largest_divisor_leq(N, target)
    pad = 0
    if Nb * 4 < target:
        # awkward N (e.g. prime): minimally pad the tail instead of tiny steps
        Nb = target
        pad = (-N) % Nb
    G = (N + pad) // Nb
    N_total = G * Nb

    x_flat = x_nchw.reshape(N, C, HW).astype(bf16)
    if pad:
        x_flat = jnp.pad(x_flat, ((0, pad), (0, 0), (0, 0)))

    # --- VMEM limit: 2x(in+out block) + constants + slack --------------------
    io_block_bytes = Nb * C * HW * 2
    const_bytes = 2 * (HW * H2W2 + H2W2 * HW + 2 * C * Cmid + C * C) \
        + 4 * (Cmid + 2 * C) + 4 * 3
    vmem_limit = int(4 * io_block_bytes + 2 * const_bytes + (8 << 20))
    vmem_limit = max(vmem_limit, 32 << 20)

    # advisory cost hint for XLA scheduling around the custom call
    flops = N_total * (4 * HW * H2W2 + 4 * C * Cmid + 2 * C * C + 6 * C * HW)
    cost = pl.CostEstimate(
        flops=int(flops),
        transcendentals=int(N_total * C * HW),
        bytes_accessed=int(2 * N_total * C * HW * 2 + const_bytes),
    )

    single = pl.Buffered(1)   # constants: constant index_map -> single-buffer

    out_flat = pl.pallas_call(
        functools.partial(_soft_attn_kernel, epilogue_dtype=epilogue_dtype),
        out_shape=jax.ShapeDtypeStruct((N_total, C, HW), out_dtype),
        grid=(G,),
        in_specs=[
            pl.BlockSpec(memory_space=pltpu.MemorySpace.SMEM),              # sp scalars
            pl.BlockSpec((Nb, C, HW), lambda i: (i, 0, 0)),                 # x block (bf16)
            pl.BlockSpec((HW, H2W2), lambda i: (0, 0), pipeline_mode=single),   # M1
            pl.BlockSpec((H2W2, HW), lambda i: (0, 0), pipeline_mode=single),   # M2
            pl.BlockSpec((C, Cmid), lambda i: (0, 0), pipeline_mode=single),    # W1^T
            pl.BlockSpec((1, Cmid), lambda i: (0, 0), pipeline_mode=single),    # b1
            pl.BlockSpec((Cmid, C), lambda i: (0, 0), pipeline_mode=single),    # W2^T
            pl.BlockSpec((1, C), lambda i: (0, 0), pipeline_mode=single),       # b2
            pl.BlockSpec((C, C), lambda i: (0, 0), pipeline_mode=single),       # Wf^T
            pl.BlockSpec((1, C), lambda i: (0, 0), pipeline_mode=single),       # bf
        ],
        out_specs=pl.BlockSpec((Nb, C, HW), lambda i: (i, 0, 0)),
        compiler_params=pltpu.CompilerParams(
            dimension_semantics=("parallel",),
            vmem_limit_bytes=vmem_limit),
        cost_estimate=cost,
    )(sp, x_flat, M1, M2, w1t, b1f, w2t, b2f, wft, bff)

    return out_flat[:N].reshape(N, C, H, W)


# --------------------------------------------------------------------------
# Deterministic parameter init (shapes from SoftAttn.__init__).
# --------------------------------------------------------------------------
def init_params(key, C, reduction=16):
    assert C % reduction == 0
    Cmid = C // reduction
    ks = jax.random.split(key, 15)

    def conv_w(k, shape, fan_in):
        return jax.random.normal(k, shape, jnp.float32) / jnp.sqrt(float(fan_in))

    def bn(k, n):
        k1, k2, k3, k4 = jax.random.split(k, 4)
        return (1.0 + 0.1 * jax.random.normal(k1, (n,), jnp.float32),   # gamma
                0.1 * jax.random.normal(k2, (n,), jnp.float32),         # beta
                0.1 * jax.random.normal(k3, (n,), jnp.float32),         # running_mean
                jax.random.uniform(k4, (n,), jnp.float32, 0.5, 1.5))    # running_var

    return dict(
        # SpatialAttn.conv1: Conv2d(1,1,3,s=2,p=1) + BN(1)
        w3=conv_w(ks[0], (1, 1, 3, 3), 9), b3=0.1 * jax.random.normal(ks[1], (1,)),
        bn3=bn(ks[2], 1),
        # SpatialAttn.conv2: Conv2d(1,1,1) + BN(1)
        w_s2=conv_w(ks[3], (1, 1, 1, 1), 1), b_s2=0.1 * jax.random.normal(ks[4], (1,)),
        bn_s2=bn(ks[5], 1),
        # ChannelAttn.conv1: Conv2d(C, C/16, 1) + BN
        w_c1=conv_w(ks[6], (Cmid, C), C), b_c1=0.1 * jax.random.normal(ks[7], (Cmid,)),
        bn_c1=bn(ks[8], Cmid),
        # ChannelAttn.conv2: Conv2d(C/16, C, 1) + BN
        w_c2=conv_w(ks[9], (C, Cmid), Cmid), b_c2=0.1 * jax.random.normal(ks[10], (C,)),
        bn_c2=bn(ks[11], C),
        # SoftAttn.conv: Conv2d(C, C, 1) + BN
        w_f=conv_w(ks[12], (C, C), C), b_f=0.1 * jax.random.normal(ks[13], (C,)),
        bn_f=bn(ks[14], C),
    )


# --------------------------------------------------------------------------
# Pure-JAX reference (NCHW), for correctness checking.
# --------------------------------------------------------------------------
def _upsample_ac(v, Ho, Wo):
    h, w = v.shape[2], v.shape[3]
    si = jnp.arange(Ho, dtype=jnp.float32) * (h - 1) / (Ho - 1)
    r0 = jnp.floor(si).astype(jnp.int32)
    r1 = jnp.minimum(r0 + 1, h - 1)
    fr = (si - r0.astype(jnp.float32))[None, None, :, None]
    vr = v[:, :, r0, :] * (1.0 - fr) + v[:, :, r1, :] * fr
    sj = jnp.arange(Wo, dtype=jnp.float32) * (w - 1) / (Wo - 1)
    c0 = jnp.floor(sj).astype(jnp.int32)
    c1 = jnp.minimum(c0 + 1, w - 1)
    fc = (sj - c0.astype(jnp.float32))[None, None, None, :]
    return vr[:, :, :, c0] * (1.0 - fc) + vr[:, :, :, c1] * fc


def soft_attn_reference(x, p):
    hi = jax.lax.Precision.HIGHEST

    def bn4(v, bnp):
        g, b, m, var = bnp
        s = g / jnp.sqrt(var + EPS)
        return v * s[None, :, None, None] + (b - s * m)[None, :, None, None]

    # spatial attention
    xm = jnp.mean(x, axis=1, keepdims=True)
    v = jax.lax.conv_general_dilated(xm, p["w3"], (2, 2), ((1, 1), (1, 1)),
                                     dimension_numbers=("NCHW", "OIHW", "NCHW"),
                                     precision=hi)
    v = v + p["b3"][None, :, None, None]
    v = jnp.maximum(bn4(v, p["bn3"]), 0.0)
    v = _upsample_ac(v, v.shape[2] * 2, v.shape[3] * 2)
    v = v * p["w_s2"][0, 0, 0, 0] + p["b_s2"][0]
    y_sp = jnp.maximum(bn4(v, p["bn_s2"]), 0.0)                 # (N,1,H,W)

    # channel attention
    xc = jnp.mean(x, axis=(2, 3))                               # (N, C)
    g, b, m, var = p["bn_c1"]
    s = g / jnp.sqrt(var + EPS)
    h = jnp.einsum("nc,mc->nm", xc, p["w_c1"], precision=hi) + p["b_c1"]
    h = jnp.maximum(h * s + (b - s * m), 0.0)
    g, b, m, var = p["bn_c2"]
    s = g / jnp.sqrt(var + EPS)
    yc = jnp.einsum("nm,cm->nc", h, p["w_c2"], precision=hi) + p["b_c2"]
    yc = jnp.maximum(yc * s + (b - s * m), 0.0)                 # (N, C)

    # combine + final conv + BN + relu + sigmoid
    y = y_sp * yc[:, :, None, None]
    z = jnp.einsum("nchw,oc->nohw", y, p["w_f"], precision=hi) + p["b_f"][None, :, None, None]
    z = jnp.maximum(bn4(z, p["bn_f"]), 0.0)
    return jax.nn.sigmoid(z)


# --------------------------------------------------------------------------
if __name__ == "__main__":
    N, C, H, W = 2, 32, 16, 16   # C must be divisible by reduction_rate=16
    key = jax.random.PRNGKey(0)
    kx, kp = jax.random.split(key)
    x = jax.random.normal(kx, (N, C, H, W), jnp.float32)
    params = init_params(kp, C)

    out = jax.jit(soft_attn_pallas)(x, params)
    out = jax.block_until_ready(out)

    ref = jax.block_until_ready(soft_attn_reference(x, params))
    assert out.shape == x.shape
    max_err = float(jnp.max(jnp.abs(out.astype(jnp.float32) - ref)))
    # tolerance covers the bf16 streamed input/output, bf16 MXU operands and
    # bf16 epilogue vs the f32 HIGHEST-precision reference (~5e-3 observed).
    if max_err > 2e-2:
        raise AssertionError(f"Pallas kernel mismatch vs reference: {max_err}")

    print("KERNEL_OK")
</pallas_src>

<mosaic_0001>
module attributes {stable_mosaic.version = 11 : i64} {
  func.func private @main(%arg0: i32) attributes {dimension_semantics = [#tpu.dimension_semantics<core_parallel>], iteration_bounds = array<i64: 2>, tpu.core_type = #tpu.core_type<sc_scalar_subcore>, window_params = []} {
    return
  }
}

module attributes {stable_mosaic.version = 11 : i64} {
  func.func private @main(%arg0: i32) attributes {dimension_semantics = [#tpu.dimension_semantics<core_parallel>], iteration_bounds = array<i64: 2>, tpu.core_type = #tpu.core_type<sc_scalar_subcore>, window_params = []} {
    return
  }
}

module attributes {stable_mosaic.version = 11 : i64} {
  func.func @_soft_attn_kernel(%arg0: i32, %arg1: memref<3xf32, #tpu.memory_space<smem>>, %arg2: memref<1x32x256xbf16, #tpu.memory_space<vmem>>, %arg3: memref<256x64xbf16, #tpu.memory_space<vmem>>, %arg4: memref<64x256xbf16, #tpu.memory_space<vmem>>, %arg5: memref<32x2xbf16, #tpu.memory_space<vmem>>, %arg6: memref<1x2xf32, #tpu.memory_space<vmem>>, %arg7: memref<2x32xbf16, #tpu.memory_space<vmem>>, %arg8: memref<1x32xf32, #tpu.memory_space<vmem>>, %arg9: memref<32x32xbf16, #tpu.memory_space<vmem>>, %arg10: memref<1x32xf32, #tpu.memory_space<vmem>>, %arg11: memref<1x32x256xbf16, #tpu.memory_space<vmem>>) attributes {dimension_semantics = [#tpu.dimension_semantics<parallel>], iteration_bounds = array<i64: 2>, scalar_prefetch = 0 : i64, scratch_operands = 0 : i64, tpu.core_type = #tpu.core_type<tc>, window_params = [{transform_indices = @transform_0, window_bounds = array<i64: 3>}, {transform_indices = @transform_1, window_bounds = array<i64: 1, 32, 256>}, {pipeline_mode = #tpu.pipeline_mode<synchronous>, transform_indices = @transform_2, window_bounds = array<i64: 256, 64>}, {pipeline_mode = #tpu.pipeline_mode<synchronous>, transform_indices = @transform_3, window_bounds = array<i64: 64, 256>}, {pipeline_mode = #tpu.pipeline_mode<synchronous>, transform_indices = @transform_4, window_bounds = array<i64: 32, 2>}, {pipeline_mode = #tpu.pipeline_mode<synchronous>, transform_indices = @transform_5, window_bounds = array<i64: 1, 2>}, {pipeline_mode = #tpu.pipeline_mode<synchronous>, transform_indices = @transform_6, window_bounds = array<i64: 2, 32>}, {pipeline_mode = #tpu.pipeline_mode<synchronous>, transform_indices = @transform_7, window_bounds = array<i64: 1, 32>}, {pipeline_mode = #tpu.pipeline_mode<synchronous>, transform_indices = @transform_8, window_bounds = array<i64: 32, 32>}, {pipeline_mode = #tpu.pipeline_mode<synchronous>, transform_indices = @transform_9, window_bounds = array<i64: 1, 32>}, {transform_indices = @transform_10, window_bounds = array<i64: 1, 32, 256>}]} {
    %c0 = arith.constant 0 : index
    %c0_0 = arith.constant 0 : index
    %c0_1 = arith.constant 0 : index
    %0 = vector.load %arg2[%c0, %c0_0, %c0_1] : memref<1x32x256xbf16, #tpu.memory_space<vmem>>, vector<1x32x256xbf16>
    %1 = arith.extf %0 : vector<1x32x256xbf16> to vector<1x32x256xf32>
    %cst = arith.constant dense<0.000000e+00> : vector<1x256xf32>
    %2 = vector.multi_reduction <add>, %1, %cst [1] : vector<1x32x256xf32> to vector<1x256xf32>
    %cst_2 = arith.constant 3.200000e+01 : f32
    %3 = vector.broadcast %cst_2 : f32 to vector<1x256xf32>
    %4 = arith.divf %2, %3 : vector<1x256xf32>
    %5 = arith.extf %0 : vector<1x32x256xbf16> to vector<1x32x256xf32>
    %cst_3 = arith.constant dense<0.000000e+00> : vector<1x32xf32>
    %6 = vector.multi_reduction <add>, %5, %cst_3 [2] : vector<1x32x256xf32> to vector<1x32xf32>
    %cst_4 = arith.constant 2.560000e+02 : f32
    %7 = vector.broadcast %cst_4 : f32 to vector<1x32xf32>
    %8 = arith.divf %6, %7 : vector<1x32xf32>
    %9 = arith.truncf %4 : vector<1x256xf32> to vector<1x256xbf16>
    %c0_5 = arith.constant 0 : index
    %c0_6 = arith.constant 0 : index
    %10 = vector.load %arg3[%c0_5, %c0_6] : memref<256x64xbf16, #tpu.memory_space<vmem>>, vector<256x64xbf16>
    %cst_7 = arith.constant dense<0.000000e+00> : vector<1x64xf32>
    %11 = tpu.matmul %9, %10, %cst_7 {dimension_numbers = #tpu.dot_dimension_numbers<[1], [0], [0], [1], [0, 0, 1, 1], [], []>} : vector<1x256xbf16>, vector<256x64xbf16>, vector<1x64xf32> -> vector<1x64xf32>
    %c0_8 = arith.constant 0 : index
    %12 = memref.load %arg1[%c0_8] : memref<3xf32, #tpu.memory_space<smem>>
    %13 = vector.broadcast %12 : f32 to vector<1x64xf32>
    %14 = arith.addf %11, %13 : vector<1x64xf32>
    %cst_9 = arith.constant 0.000000e+00 : f32
    %15 = vector.broadcast %cst_9 : f32 to vector<1x64xf32>
    %16 = arith.maximumf %14, %15 : vector<1x64xf32>
    %17 = arith.truncf %16 : vector<1x64xf32> to vector<1x64xbf16>
    %c0_10 = arith.constant 0 : index
    %c0_11 = arith.constant 0 : index
    %18 = vector.load %arg4[%c0_10, %c0_11] : memref<64x256xbf16, #tpu.memory_space<vmem>>, vector<64x256xbf16>
    %cst_12 = arith.constant dense<0.000000e+00> : vector<1x256xf32>
    %19 = tpu.matmul %17, %18, %cst_12 {dimension_numbers = #tpu.dot_dimension_numbers<[1], [0], [0], [1], [0, 0, 1, 1], [], []>} : vector<1x64xbf16>, vector<64x256xbf16>, vector<1x256xf32> -> vector<1x256xf32>
    %c1 = arith.constant 1 : index
    %20 = memref.load %arg1[%c1] : memref<3xf32, #tpu.memory_space<smem>>
    %21 = vector.broadcast %20 : f32 to vector<1x256xf32>
    %22 = arith.mulf %21, %19 : vector<1x256xf32>
    %c2 = arith.constant 2 : index
    %23 = memref.load %arg1[%c2] : memref<3xf32, #tpu.memory_space<smem>>
    %24 = vector.broadcast %23 : f32 to vector<1x256xf32>
    %25 = arith.addf %22, %24 : vector<1x256xf32>
    %cst_13 = arith.constant 0.000000e+00 : f32
    %26 = vector.broadcast %cst_13 : f32 to vector<1x256xf32>
    %27 = arith.maximumf %25, %26 : vector<1x256xf32>
    %28 = arith.truncf %8 : vector<1x32xf32> to vector<1x32xbf16>
    %c0_14 = arith.constant 0 : index
    %c0_15 = arith.constant 0 : index
    %29 = vector.load %arg5[%c0_14, %c0_15] : memref<32x2xbf16, #tpu.memory_space<vmem>>, vector<32x2xbf16>
    %cst_16 = arith.constant dense<0.000000e+00> : vector<1x2xf32>
    %30 = tpu.matmul %28, %29, %cst_16 {dimension_numbers = #tpu.dot_dimension_numbers<[1], [0], [0], [1], [0, 0, 1, 1], [], []>} : vector<1x32xbf16>, vector<32x2xbf16>, vector<1x2xf32> -> vector<1x2xf32>
    %c0_17 = arith.constant 0 : index
    %c0_18 = arith.constant 0 : index
    %31 = vector.load %arg6[%c0_17, %c0_18] : memref<1x2xf32, #tpu.memory_space<vmem>>, vector<1x2xf32>
    %32 = arith.addf %30, %31 : vector<1x2xf32>
    %cst_19 = arith.constant 0.000000e+00 : f32
    %33 = vector.broadcast %cst_19 : f32 to vector<1x2xf32>
    %34 = arith.maximumf %32, %33 : vector<1x2xf32>
    %35 = arith.truncf %34 : vector<1x2xf32> to vector<1x2xbf16>
    %c0_20 = arith.constant 0 : index
    %c0_21 = arith.constant 0 : index
    %36 = vector.load %arg7[%c0_20, %c0_21] : memref<2x32xbf16, #tpu.memory_space<vmem>>, vector<2x32xbf16>
    %cst_22 = arith.constant dense<0.000000e+00> : vector<1x32xf32>
    %37 = tpu.matmul %35, %36, %cst_22 {dimension_numbers = #tpu.dot_dimension_numbers<[1], [0], [0], [1], [0, 0, 1, 1], [], []>} : vector<1x2xbf16>, vector<2x32xbf16>, vector<1x32xf32> -> vector<1x32xf32>
    %c0_23 = arith.constant 0 : index
    %c0_24 = arith.constant 0 : index
    %38 = vector.load %arg8[%c0_23, %c0_24] : memref<1x32xf32, #tpu.memory_space<vmem>>, vector<1x32xf32>
    %39 = arith.addf %37, %38 : vector<1x32xf32>
    %cst_25 = arith.constant 0.000000e+00 : f32
    %40 = vector.broadcast %cst_25 : f32 to vector<1x32xf32>
    %41 = arith.maximumf %39, %40 : vector<1x32xf32>
    %42 = arith.truncf %41 : vector<1x32xf32> to vector<1x32xbf16>
    %c0_26 = arith.constant 0 : index
    %c0_27 = arith.constant 0 : index
    %43 = vector.load %arg9[%c0_26, %c0_27] : memref<32x32xbf16, #tpu.memory_space<vmem>>, vector<32x32xbf16>
    %cst_28 = arith.constant dense<0.000000e+00> : vector<1x32xf32>
    %44 = tpu.matmul %42, %43, %cst_28 {dimension_numbers = #tpu.dot_dimension_numbers<[1], [0], [0], [1], [0, 0, 1, 1], [], []>} : vector<1x32xbf16>, vector<32x32xbf16>, vector<1x32xf32> -> vector<1x32xf32>
    %45 = arith.truncf %44 : vector<1x32xf32> to vector<1x32xbf16>
    %46 = vector.shape_cast %45 : vector<1x32xbf16> to vector<1x32x1xbf16>
    %47 = arith.truncf %27 : vector<1x256xf32> to vector<1x256xbf16>
    %48 = vector.shape_cast %47 : vector<1x256xbf16> to vector<1x1x256xbf16>
    %49 = vector.broadcast %46 : vector<1x32x1xbf16> to vector<1x32x256xbf16>
    %50 = vector.broadcast %48 : vector<1x1x256xbf16> to vector<1x32x256xbf16>
    %51 = arith.mulf %49, %50 : vector<1x32x256xbf16>
    %c0_29 = arith.constant 0 : index
    %c0_30 = arith.constant 0 : index
    %52 = vector.load %arg10[%c0_29, %c0_30] : memref<1x32xf32, #tpu.memory_space<vmem>>, vector<1x32xf32>
    %53 = arith.truncf %52 : vector<1x32xf32> to vector<1x32xbf16>
    %54 = vector.shape_cast %53 : vector<1x32xbf16> to vector<1x32x1xbf16>
    %55 = vector.broadcast %54 : vector<1x32x1xbf16> to vector<1x32x256xbf16>
    %56 = arith.addf %51, %55 : vector<1x32x256xbf16>
    %cst_31 = arith.constant 0.000000e+00 : bf16
    %57 = vector.broadcast %cst_31 : bf16 to vector<1x32x256xbf16>
    %58 = arith.maximumf %56, %57 : vector<1x32x256xbf16>
    %59 = arith.negf %58 : vector<1x32x256xbf16>
    %60 = math.exp %59 : vector<1x32x256xbf16>
    %cst_32 = arith.constant 1.000000e+00 : bf16
    %61 = vector.broadcast %cst_32 : bf16 to vector<1x32x256xbf16>
    %62 = arith.addf %61, %60 : vector<1x32x256xbf16>
    %63 = arith.divf %61, %62 : vector<1x32x256xbf16>
    %c0_33 = arith.constant 0 : index
    %c0_34 = arith.constant 0 : index
    %c0_35 = arith.constant 0 : index
    %64 = vector.load %arg11[%c0_33, %c0_34, %c0_35] : memref<1x32x256xbf16, #tpu.memory_space<vmem>>, vector<1x32x256xbf16>
    tpu.vector_store %arg11[%c0_33, %c0_34, %c0_35], %63 {strides = array<i32>} : memref<1x32x256xbf16, #tpu.memory_space<vmem>>, vector<1x32x256xbf16>,
    return
  }
  func.func @transform_0(%arg0: i32) -> i32 {
    %c0_i32 = arith.constant 0 : i32
    %c0_i32_0 = arith.constant 0 : i32
    return %c0_i32 : i32
  }
  func.func @transform_1(%arg0: i32) -> (i32, i32, i32) {
    %c0_i32 = arith.constant 0 : i32
    %c0_i32_0 = arith.constant 0 : i32
    %c0_i32_1 = arith.constant 0 : i32
    return %arg0, %c0_i32, %c0_i32_0 : i32, i32, i32
  }
  func.func @transform_2(%arg0: i32) -> (i32, i32) {
    %c0_i32 = arith.constant 0 : i32
    %c0_i32_0 = arith.constant 0 : i32
    %c0_i32_1 = arith.constant 0 : i32
    return %c0_i32, %c0_i32_0 : i32, i32
  }
  func.func @transform_3(%arg0: i32) -> (i32, i32) {
    %c0_i32 = arith.constant 0 : i32
    %c0_i32_0 = arith.constant 0 : i32
    %c0_i32_1 = arith.constant 0 : i32
    return %c0_i32, %c0_i32_0 : i32, i32
  }
  func.func @transform_4(%arg0: i32) -> (i32, i32) {
    %c0_i32 = arith.constant 0 : i32
    %c0_i32_0 = arith.constant 0 : i32
    %c0_i32_1 = arith.constant 0 : i32
    return %c0_i32, %c0_i32_0 : i32, i32
  }
  func.func @transform_5(%arg0: i32) -> (i32, i32) {
    %c0_i32 = arith.constant 0 : i32
    %c0_i32_0 = arith.constant 0 : i32
    %c0_i32_1 = arith.constant 0 : i32
    return %c0_i32, %c0_i32_0 : i32, i32
  }
  func.func @transform_6(%arg0: i32) -> (i32, i32) {
    %c0_i32 = arith.constant 0 : i32
    %c0_i32_0 = arith.constant 0 : i32
    %c0_i32_1 = arith.constant 0 : i32
    return %c0_i32, %c0_i32_0 : i32, i32
  }
  func.func @transform_7(%arg0: i32) -> (i32, i32) {
    %c0_i32 = arith.constant 0 : i32
    %c0_i32_0 = arith.constant 0 : i32
    %c0_i32_1 = arith.constant 0 : i32
    return %c0_i32, %c0_i32_0 : i32, i32
  }
  func.func @transform_8(%arg0: i32) -> (i32, i32) {
    %c0_i32 = arith.constant 0 : i32
    %c0_i32_0 = arith.constant 0 : i32
    %c0_i32_1 = arith.constant 0 : i32
    return %c0_i32, %c0_i32_0 : i32, i32
  }
  func.func @transform_9(%arg0: i32) -> (i32, i32) {
    %c0_i32 = arith.constant 0 : i32
    %c0_i32_0 = arith.constant 0 : i32
    %c0_i32_1 = arith.constant 0 : i32
    return %c0_i32, %c0_i32_0 : i32, i32
  }
  func.func @transform_10(%arg0: i32) -> (i32, i32, i32) {
    %c0_i32 = arith.constant 0 : i32
    %c0_i32_0 = arith.constant 0 : i32
    %c0_i32_1 = arith.constant 0 : i32
    return %arg0, %c0_i32, %c0_i32_0 : i32, i32, i32
  }
}

</mosaic_0001>

<bundles_post_ra>
// kernel: soft_attn_pallas.1
= control target key start
LH: loop header
LB: loop body
LE: loop exit
PB: predicated region body
PF: predicated region fallthrough
CT: control target
= control target key end

     0   :  { %15 = vsyncpa [#allocation3], 0  ;;  %s1356_s13 = smov 0   ;;  %s1523_s0 = inlined_call_operand.vmem [shape: f32[3], index: 0, kind: input, shape index: {}]   ;;  %s1524_s1 = inlined_call_operand.vmem [shape: bf16[2,32,256], index: 1, kind: input, shape index: {}]   ;;  %s1525_s2 = inlined_call_operand.vmem [shape: bf16[256,64], index: 2, kind: input, shape index: {}]   ;;  %s1526_s3 = inlined_call_operand.vmem [shape: bf16[64,256], index: 3, kind: input, shape index: {}]   ;;  %s1527_s4 = inlined_call_operand.vmem [shape: bf16[32,2], index: 4, kind: input, shape index: {}]   ;;  %s1528_s5 = inlined_call_operand.vmem [shape: f32[1,2], index: 5, kind: input, shape index: {}]   ;;  %s1529_s6 = inlined_call_operand.vmem [shape: bf16[2,32], index: 6, kind: input, shape index: {}]   ;;  %s1530_s7 = inlined_call_operand.vmem [shape: f32[1,32], index: 7, kind: input, shape index: {}]   ;;  %s1531_s8 = inlined_call_operand.vmem [shape: bf16[32,32], index: 8, kind: input, shape index: {}]   ;;  %s1532_s9 = inlined_call_operand.vmem [shape: f32[1,32], index: 9, kind: input, shape index: {}]   ;;  %s1533_s10 = inlined_call_operand.vmem [shape: bf16[2,32,256], index: 10, kind: output, shape index: {}]  }
   0x1 LB: > { %s1362_s14 = sadd.s32 4294967295, %s1295_s13   ;;  %p1093_p0 = scmp.ge.s32.totalorder %s1295_s13, 1  ;;  %s1295_s13 = sphi %s1356_s13, %s21_s13  }
   0x2   : > { %p267_p1 = scmp.lt.s32.totalorder %s1295_s13, 3  ;;  %s280_s17 = sshll.u32 %s1523_s0, 4  ;;  %s281_s17 = int_to_ptr.vmem [resolvable:$true] %s280_s17 }
   0x3   : > { %p1208_p3 = scmp.eq.s32.totalorder %s1362_s14, 0  ;;  %s1270_s19 = scalar_lea.vmem %s281_s17, 16 }
   0x4   : > { %p1369_p2 = pnand %p1093_p0, %p267_p1  ;;  %p1271_p6 = scmp.ne.s32.totalorder %s281_s17, %s1270_s19 }
   0x5   : > { %p1278_p10 = scmp.lt.s32.totalorder %s281_s17, %s281_s17  ;;  %p1279_p11 = scmp.lt.s32.totalorder %s1270_s19, %s1270_s19 }
   0x6   : > { %p1204_p4 = pneg %p1369_p2 }
   0x7   : > { %p1280_p12 = por %p1279_p11, %p1278_p10 }
   0x8   : > { %p1205_p5 = pnand %p1208_p3, %p1204_p4 }
   0xa   : > { %p1272_p7 = pneg %p1205_p5 }
   0xc   : > { %p1273_p8 = pnand %p1272_p7, %p1271_p6 }
   0xe   : > { %p1274_p9 = pneg %p1273_p8 }
  0x10   : > { %p1281_p13 = pnand %p1280_p12, %p1274_p9 }
  0x12   : > { %1284 = shalt.err (!%p1281_p13)
}
  0x13   : > { %s1297_s20 = smov [#allocation2]   ;;  %325 = sbr.rel (%p1369_p2) target bundleno = 1102 (0x44e), region = 60 }
  0x14   : > { %1207 = dma.vmem_to_smem (!%p1205_p5), %s281_s17, 16, %s1297_s20, [#allocation3]  }
  0x1a   : > { %1290 = dma.done.wait (%p1208_p3), [#allocation3], 16  }
  0x1b   : > { %1292 = vsyncadd (%p1208_p3), [#allocation3], 4294967280 }
  0x1c   : > { %331 = sfence }
  0x1d   : > { %v1222_v0 = vld [vmem:[%s1525_s2 + $0x40] sm:$0xff]   ;;  %v1224_v2 = vld [vmem:[%s1525_s2 + $0x48] sm:$0xff]   ;;  %p364_p0 = scmp.lt.s32.totalorder %s1362_s14, 1  ;;  %v1226_v4 = vld [vmem:[%s1525_s2 + $0x50] sm:$0xff]   ;;  %v1298_v62 = vmov 0   ;;  %v1299_v63 = vmov 0.0  }
  0x1e   : > { %v1223_v1 = vld [vmem:[%s1525_s2] sm:$0xff]   ;;  %1148 = vmatprep.subr.bf16.mxu0 %v1222_v0  ;;  %v1225_v3 = vld [vmem:[%s1525_s2 + $0x8] sm:$0xff]   ;;  %v1227_v5 = vld [vmem:[%s1525_s2 + $0x10] sm:$0xff]   ;;  %684 = vmatprep.mubr.bf16.mxu1 %v1298_v62  ;;  %vm1300_vm0 = vmmov 0   ;;  %s460_s21 = sld [smem:[#allocation2]]  ;;  %vm727_vm1 = vcmask 130112  }
  0x1f   : > { %1149 = vmatpush3.bf16.msra.mxu0 %v1223_v1  ;;  %s1536_s14 = smov (!%p364_p0, %s1362_s14), 1  ;;  %v1228_v6 = vld [vmem:[%s1525_s2 + $0x58] sm:$0xff]   ;;  %v1230_v8 = vld [vmem:[%s1525_s2 + $0x60] sm:$0xff]   ;;  %v1232_v10 = vld [vmem:[%s1525_s2 + $0x68] sm:$0xff]   ;;  %vm734_vm2 = vcmask 195712   ;;  %vm648_vm3 = vcmask 523264  }
  0x20   : > { %1150 = vmatprep.subr.bf16.mxu0 %v1224_v2  ;;  %s1146_s17 = sshll.u32 %s1536_s14, 5  ;;  %v1229_v7 = vld [vmem:[%s1525_s2 + $0x18] sm:$0xff]   ;;  %v1231_v9 = vld [vmem:[%s1525_s2 + $0x20] sm:$0xff]   ;;  %v1233_v14 = vld [vmem:[%s1525_s2 + $0x28] sm:$0xff]   ;;  %v716_v2 = vlaneseq  ;;  %vm741_vm4 = vcmask 261312   ;;  %vm756_vm5 = vcmask 261120  }
  0x21   : > { %s368_s24 = scalar_lea.vmem %s1524_s1, %s1146_s17  ;;  %v1234_v20 = vld [vmem:[%s1525_s2 + $0x70] sm:$0xff]   ;;  %v1238_v24 = vld [vmem:[%s1526_s3 + $0x4] ss:$8 sps:$4 sm:$0xff]   ;;  %v1240_v25 = vld [vmem:[%s1526_s3] ss:$8 sps:$4 sm:$0xff]   ;;  %vm808_vm6 = vcmask 1040384   ;;  %s373_s25 = scalar_lea.vmem %s1533_s10, %s1146_s17 }
  0x22   : > { %v376_v11 = vld [vmem:[%s368_s24] sm:$0xff]  ;;  %v377_v12 = vld [vmem:[%s368_s24 + $0x8] sm:$0xff]  ;;  %v378_v13 = vld [vmem:[%s368_s24 + $0x10] sm:$0xff]  ;;  %652 = vmatprep.subr.bf16.mxu1 %v1238_v24  ;;  %vm804_vm7 = vcmask 15360   ;;  %s1128_s22 = sld [smem:[#allocation2 + $0x2]] }
  0x23   : > { %1151 = vmatpush3.bf16.msra.mxu0 %v1225_v3  ;;  %v379_v15 = vld [vmem:[%s368_s24 + $0x18] sm:$0xff]  ;;  %v380_v16 = vunpack.c.l.bf16 %v376_v11  ;;  %v381_v17 = vunpack.c.h.bf16 %v376_v11  ;;  %v382_v18 = vunpack.c.l.bf16 %v377_v12  ;;  %v383_v19 = vunpack.c.h.bf16 %v377_v12  ;;  %653 = vmatpush1.bf16.msra.mxu1 %v1240_v25  ;;  %v1235_v35 = vld [vmem:[%s1525_s2 + $0x30] sm:$0xff]   ;;  %v1244_v58 = vld [vmem:[%s1526_s3 + $0x24] ss:$8 sps:$4 sm:$0xff]  }
  0x24   : > { %1152 = vmatprep.subr.bf16.mxu0 %v1226_v4  ;;  %v384_v21 = vunpack.c.l.bf16 %v378_v13  ;;  %v385_v22 = vunpack.c.h.bf16 %v378_v13  ;;  %v386_v23 = vunpack.c.l.bf16 %v379_v15  ;;  %v387_v26 = vunpack.c.h.bf16 %v379_v15  ;;  %v1236_v38 = vld [vmem:[%s1525_s2 + $0x78] sm:$0xff]   ;;  %v1246_v59 = vld [vmem:[%s1526_s3 + $0x20] ss:$8 sps:$4 sm:$0xff]  }
  0x25   : > { %v397_v27 = vadd.f32 %v383_v19, %v381_v17  ;;  %v388_v28 = vadd.f32 %v382_v18, %v380_v16  ;;  %v409_v29 = vadd.f32 %v381_v17, %v380_v16  ;;  %v412_v33 = vadd.f32 %v383_v19, %v382_v18  ;;  %v1237_v41 = vld [vmem:[%s1525_s2 + $0x38] sm:$0xff]  }
  0x26   : > { %v415_v30 = vadd.f32 %v385_v22, %v384_v21  ;;  %v418_v34 = vadd.f32 %v387_v26, %v386_v23  ;;  %v1241_v52 = vld [vmem:[%s1526_s3 + $0x14] ss:$8 sps:$4 sm:$0xff]   ;;  %v1243_v53 = vld [vmem:[%s1526_s3 + $0x10] ss:$8 sps:$4 sm:$0xff]  }
  0x27   : > { %1153 = vmatpush3.bf16.msra.mxu0 %v1227_v5  ;;  %v398_v31 = vadd.f32 %v397_v27, %v385_v22  ;;  %v389_v32 = vadd.f32 %v388_v28, %v384_v21  ;;  %410 = vadd.xlane.f32.xlu0 %v409_v29  ;;  %v1247_v60 = vld [vmem:[%s1526_s3 + $0x34] ss:$8 sps:$4 sm:$0xff]   ;;  %v1249_v61 = vld [vmem:[%s1526_s3 + $0x30] ss:$8 sps:$4 sm:$0xff]   ;;  %v717_v5 = vand.u32 127, %v716_v2  ;;  %v461_v21 = vstv %s460_s21  ;;  %s1127_s21 = sld [smem:[#allocation2 + $0x1]] }
  0x28   : > { %1154 = vmatprep.subr.bf16.mxu0 %v1228_v6  ;;  %416 = vadd.xlane.f32.xlu1 %v415_v30 }
  0x29   : > { %v399_v36 = vadd.f32 %v398_v31, %v387_v26  ;;  %v390_v37 = vadd.f32 %v389_v32, %v386_v23  ;;  %654 = vmatprep.subr.bf16.mxu1 %v1241_v52  ;;  %v722_v11 = vadd.s32 4294967288, %v717_v5  ;;  %v729_v13 = vadd.s32 4294967280, %v717_v5 }
  0x2a   : > { %655 = vmatpush1.bf16.msra.mxu1 %v1243_v53 }
  0x2b   : > { %1155 = vmatpush3.bf16.msra.mxu0 %v1229_v7  ;;  %v400_v39 = vrot.slane %v399_v36, 4  ;;  %v391_v40 = vrot.slane %v390_v37, 4  ;;  %413 = vadd.xlane.f32.xlu0 %v412_v33 }
  0x2c   : > { %1156 = vmatprep.subr.bf16.mxu0 %v1230_v8  ;;  %419 = vadd.xlane.f32.xlu1 %v418_v34 }
  0x2d   : > { %v401_v42 = vadd.f32 %v400_v39, %v399_v36  ;;  %v392_v43 = vadd.f32 %v391_v40, %v390_v37  ;;  %656 = vmatprep.subr.bf16.mxu1 %v1244_v58  ;;  %v1250_v36 = vld [vmem:[%s1527_s4] sm:$0xff]   ;;  %v1251_v40 = vld [vmem:[%s1527_s4 + $0x8] sm:$0xff]  }
  0x2e   : > { %657 = vmatpush1.bf16.msra.mxu1 %v1246_v59  ;;  %v1253_v58 = vld [vmem:[%s1531_s8 + $0x8] sm:$0xff]   ;;  %v803_v59 = vld [vmem:[%s1530_s7] sm:$0x1] }
  0x2f   : > { %1157 = vmatpush3.bf16.msra.mxu0 %v1231_v9  ;;  %v402_v44 = vrot.slane %v401_v42, 2  ;;  %v393_v45 = vrot.slane %v392_v43, 2  ;;  %658 = vmatprep.subr.bf16.mxu1 %v1247_v60 }
  0x30   : > { %1158 = vmatprep.subr.bf16.mxu0 %v1232_v10  ;;  %v1471_v10 = vshrl.u32 %v716_v2, 7 }
  0x31   : > { %v403_v46 = vadd.f32 %v402_v44, %v401_v42  ;;  %v394_v47 = vadd.f32 %v393_v45, %v392_v43  ;;  %v802_v43 = vld [vmem:[%s1529_s6] sm:$0x1] }
  0x32   : > { %659 = vmatpush1.bf16.msra.mxu1 %v1249_v61  ;;  %v720_v15 = vsub.s32 %v717_v5, %v1471_v10  ;;  %v725_v16 = vsub.s32 %v722_v11, %v1471_v10  ;;  %v732_v23 = vsub.s32 %v729_v13, %v1471_v10  ;;  %v810_v44 = vsel %vm808_vm6, %v802_v43, 0  ;;  %v1252_v45 = vld [vmem:[%s1531_s8] sm:$0xff]  }
  0x33   : > { %1159 = vmatpush3.bf16.msra.mxu0 %v1233_v14  ;;  %v404_v48 = vrot.slane %v403_v46, 1  ;;  %v395_v49 = vrot.slane %v394_v47, 1  ;;  %1178 = vmatprep.subr.bf16.mxu1 %v1299_v63 }
  0x34   : > { %1160 = vmatprep.subr.bf16.mxu0 %v1234_v20  ;;  %v736_v20 = vadd.s32 4294967272, %v717_v5 }
  0x35   : > { %v405_v50 = vadd.f32 %v404_v48, %v403_v46  ;;  %v396_v51 = vadd.f32 %v395_v49, %v394_v47 }
  0x36   : > { %v739_v31 = vsub.s32 %v736_v20, %v1471_v10  ;;  %v698_v20 = vstv %s1128_s22 }
  0x37   : > { %1161 = vmatpush3.bf16.msra.mxu0 %v1235_v35  ;;  %v408_v54 = vmul.f32 0.03125, %v405_v50  ;;  %v407_v55 = vmul.f32 0.03125, %v396_v51  ;;  %v709_v50 = vld [vmem:[%s1528_s5] sm:$0x1] }
  0x38   : > { %1162 = vmatprep.subr.bf16.mxu0 %v1236_v38 }
  0x39   : > { %v427_v56 = vpack.c.bf16 %v408_v54, %v408_v54  ;;  %v426_v57 = vpack.c.bf16 %v407_v55, %v407_v55 }
  0x3b   : > { %1163 = vmatpush3.bf16.msra.mxu0 %v1237_v41  ;;  %590 = vmatprep.mubr.bf16.mxu0 %v427_v56 }
  0x3c   : > { %1192 = vmatprep.subr.bf16.mxu0 %v1299_v63 }
  0x3e   : > { %591 = vmatmul.mubr.bf16.vlgmr.msra.gmra.mrb[0].mxu0 %v426_v57 }
  0x3f   : > { %1196 = vmatprep.mubr.msk.bf16.mxu0 %vm1300_vm0, %v1299_v63  ;;  %1193 = vmatpush3.bf16.msra.mxu0 %v1252_v45 }
  0x40   : > { %1194 = vmatprep.subr.bf16.mxu0 %v1299_v63 }
  0x43   : > { %1195 = vmatpush3.bf16.msra.mxu0 %v1253_v58 }
  0xb4   : > { %v411_v0 = vpop.xlane.xlu0 %410 }
  0xb5   : > { %v417_v1 = vpop.xlane.xlu1 %416  ;;  %v422_v4 = vmul.f32 0.00390625, %v411_v0 }
  0xb6   : > { %v424_v8 = vmul.f32 0.00390625, %v417_v1 }
  0xb8   : > { %v414_v3 = vpop.xlane.xlu0 %413 }
  0xb9   : > { %v423_v6 = vmul.f32 0.00390625, %v414_v3  ;;  %v420_v7 = vpop.xlane.xlu1 %419 }
  0xba   : > { %v425_v9 = vmul.f32 0.00390625, %v420_v7 }
  0xbb   : > { %v703_v12 = vpack.c.bf16 %v423_v6, %v422_v4  ;;  %v948_v4 = vld [vmem:[%s1532_s9] sm:$0x1]  ;;  %v919_v6 = vsub.s32 0, %v1471_v10 }
  0xbc   : > { %v704_v14 = vpack.c.bf16 %v425_v9, %v424_v8  ;;  %v949_v5 = vpack.c.bf16 %v948_v4, %v948_v4 }
  0xbd   : > { %v712_v17 = vunpack.c.l.b16 %v703_v12  ;;  %v713_v18 = vunpack.c.h.b16 %v703_v12 }
  0xbe   : > { %v714_v24 = vunpack.c.l.b16 %v704_v14  ;;  %v715_v32 = vunpack.c.h.b16 %v704_v14  ;;  %v951_v7 = vpack.i.b16 %v949_v5, %v949_v5 }
  0xbf   : > { %v721_v27 = vrot.slane %v712_v17, %v720_v15  ;;  %v726_v28 = vrot.slane %v713_v18, %v725_v16  ;;  %v694_v17 = vstv %s1127_s21 }
  0xc0   : > { %v733_v33 = vrot.slane %v714_v24, %v732_v23  ;;  %v740_v38 = vrot.slane %v715_v32, %v739_v31  ;;  %v956_v8 = vrot.slane %v951_v7, %v919_v6 }
  0xc1   : > { %v728_v35 = vsel %vm727_vm1, %v726_v28, %v721_v27 }
  0xc2   : > { %v735_v39 = vsel %vm734_vm2, %v733_v33, %v728_v35  ;;  %958 = vbcast.lane.c.b16.xlu1 %v956_v8, 256 }
  0xc3   : > { %v742_v41 = vsel %vm741_vm4, %v740_v38, %v735_v39 }
  0xc4   : > { %v743_v42 = vpack.c.b16 %v742_v41, %v742_v41 }
 0x111   : > { %v1164_v19 = vpop.f32.mrb[0].mxu0 }
 0x112   : > { %v1165_v22 = vpop.f32.mrb[1].mxu0 }
 0x113   : > { %v1166_v25 = vadd.f32 %v1165_v22, %v1164_v19  ;;  %v1167_v26 = vpop.f32.mrb[2].mxu0 }
 0x114   : > { %v1168_v29 = vpop.f32.mrb[3].mxu0 }
 0x115   : > { %v593_v30 = vadd.f32 %v1166_v25, %v461_v21 }
 0x117   : > { %v598_v34 = vmax.f32 %v593_v30, 0.0 }
 0x119   : > { %v599_v37 = vpack.c.bf16 %v598_v34, %v598_v34 }
 0x11b   : > { %1126 = vmatmul.mubr.msk.bf16.vlgmr.msra.gmra.mrb[0].mxu1 %vm648_vm3, %v599_v37 }
 0x11c   : > { %1179 = vmatpush3.bf16.msra.mxu1 %v1250_v36  ;;  %1182 = vmatprep.mubr.msk.bf16.mxu1 %vm1300_vm0, %v1299_v63 }
 0x11d   : > { %1180 = vmatprep.subr.bf16.mxu1 %v1299_v63 }
 0x120   : > { %1181 = vmatpush3.bf16.msra.mxu1 %v1251_v40 }
 0x121   : > { %1186 = vmatprep.subr.bf16.mxu1 %v1299_v63 }
 0x123   : > { %1183 = vmatmul.mubr.msk.bf16.vlgmr.msra.gmra.mrb[4].mxu1 %vm756_vm5, %v743_v42 }
 0x124   : > { %1188 = vmatprep.mubr.msk.bf16.mxu1 %vm1300_vm0, %v1299_v63  ;;  %1187 = vmatpush3.bf16.msra.mxu1 %v810_v44 }
 0x134   : > { %v959_v26 = vpop.permute.xlu1 %958 }
 0x1ee   : > { %v686_v46 = vpop.f32.mrb[0].mxu1 }
 0x1ef   : > { %v688_v47 = vpop.f32.mrb[1].mxu1  ;;  %v695_v18 = vmul.f32 %v694_v17, %v686_v46 }
 0x1f0   : > { %v690_v48 = vpop.f32.mrb[2].mxu1  ;;  %v696_v19 = vmul.f32 %v694_v17, %v688_v47 }
 0x1f1   : > { %v691_v49 = vpop.f32.mrb[3].mxu1  ;;  %v699_v10 = vadd.f32 %v698_v20, %v695_v18 }
 0x1f2   : > { %v700_v21 = vadd.f32 %v698_v20, %v696_v19 }
 0x1f3   : > { %v701_v22 = vmax.f32 %v699_v10, 0.0 }
 0x1f4   : > { %v702_v23 = vmax.f32 %v700_v21, 0.0 }
 0x1f5   : > { %v928_v24 = vpack.c.bf16 %v701_v22, %v701_v22 }
 0x1f6   : > { %v794_v51 = vpop.f32.mrb[4].mxu1  ;;  %v929_v25 = vpack.c.bf16 %v702_v23, %v702_v23 }
 0x1f7   : > { %v795_v52 = vadd.f32 %v794_v51, %v709_v50  ;;  %v1184_v53 = vpop.f32.mrb[5].mxu1  ;;  %v931_v27 = vpack.i.b16 %v928_v24, %v928_v24 }
 0x1f8   : > { %v797_v54 = vpop.f32.mrb[6].mxu1  ;;  %v938_v28 = vpack.i.b16 %v929_v25, %v929_v25 }
 0x1f9   : > { %v800_v55 = vmax.f32 %v795_v52, 0.0  ;;  %v1185_v56 = vpop.f32.mrb[7].mxu1  ;;  %v936_v29 = vrot.slane %v931_v27, %v919_v6 }
 0x1fa   : > { %v943_v30 = vrot.slane %v938_v28, %v919_v6 }
 0x1fb   : > { %v801_v57 = vpack.c.bf16 %v800_v55, %v800_v55 }
 0x1fd   : > { %1189 = vmatmul.mubr.msk.bf16.vlgmr.msra.gmra.mrb[8].mxu1 %vm804_vm7, %v801_v57 }
 0x2d0   : > { %v846_v60 = vpop.f32.mrb[8].mxu1 }
 0x2d1   : > { %v847_v61 = vadd.f32 %v846_v60, %v803_v59  ;;  %v1190_v63 = vpop.f32.mrb[9].mxu1 }
 0x2d2   : > { %v849_v0 = vpop.f32.mrb[10].mxu1 }
 0x2d3   : > { %v852_v1 = vmax.f32 %v847_v61, 0.0  ;;  %v1191_v2 = vpop.f32.mrb[11].mxu1 }
 0x2d5   : > { %v853_v3 = vpack.c.bf16 %v852_v1, %v852_v1 }
 0x2d7   : > { %1197 = vmatmul.mubr.msk.bf16.vlgmr.msra.gmra.mrb[4].mxu0 %vm756_vm5, %v853_v3 }
 0x3aa   : > { %v907_v9 = vpop.f32.mrb[4].mxu0 }
 0x3ab   : > { %v913_v11 = vpack.c.bf16 %v907_v9, %v907_v9  ;;  %v1198_v12 = vpop.f32.mrb[5].mxu0 }
 0x3ac   : > { %v910_v13 = vpop.f32.mrb[6].mxu0 }
 0x3ad   : > { %v915_v14 = vpack.i.b16 %v913_v11, %v913_v11  ;;  %v1199_v15 = vpop.f32.mrb[7].mxu0 }
 0x3af   : > { %v920_v16 = vrot.slane %v915_v14, %v919_v6 }
 0x3b1   : > { %926 = vbcast.lane.c.b16.xlu1 %v920_v16, 272  ;;  %922 = vbcast.lane.c.b16.xlu0 %v920_v16, 256 }
 0x3b5   : > { %962 = vbcast.lane.c.b16.xlu1 %v956_v8, 272 }
 0x423   : > { %v927_v31 = vpop.permute.xlu1 %926  ;;  %v923_v32 = vpop.permute.xlu0 %922 }
 0x424   : > { %v944_v33 = vmul.bf16 %v936_v29, %v923_v32  ;;  %v945_v34 = vmul.bf16 %v943_v30, %v923_v32  ;;  %v946_v35 = vmul.bf16 %v936_v29, %v927_v31  ;;  %v947_v36 = vmul.bf16 %v943_v30, %v927_v31 }
 0x426   : > { %v964_v37 = vadd.bf16 %v959_v26, %v944_v33  ;;  %v965_v38 = vadd.bf16 %v959_v26, %v945_v34 }
 0x427   : > { %v963_v39 = vpop.permute.xlu1 %962 }
 0x428   : > { %v968_v40 = vmax.bf16 %v1298_v62, %v964_v37  ;;  %v969_v41 = vmax.bf16 %v1298_v62, %v965_v38  ;;  %v966_v42 = vadd.bf16 %v963_v39, %v946_v35  ;;  %v967_v43 = vadd.bf16 %v963_v39, %v947_v36 }
 0x42a   : > { %v1136_v44 = vmul.bf16 3216621497, %v968_v40  ;;  %v1137_v45 = vmul.bf16 3216621497, %v969_v41  ;;  %v970_v46 = vmax.bf16 %v1298_v62, %v966_v42  ;;  %v971_v47 = vmax.bf16 %v1298_v62, %v967_v43 }
 0x42c   : > { %1254 = vpow.bf16 %v1136_v44  ;;  %v1138_v48 = vmul.bf16 3216621497, %v970_v46  ;;  %v1139_v49 = vmul.bf16 3216621497, %v971_v47 }
 0x42d   : > { %1256 = vpow.bf16 %v1137_v45 }
 0x42e   : > { %1258 = vpow.bf16 %v1138_v48 }
 0x42f   : > { %1260 = vpow.bf16 %v1139_v49 }
 0x437   : > { %v1255_v50 = vpop.eup %1254 }
 0x438   : > { %v1257_v51 = vpop.eup %1256  ;;  %v988_v52 = vadd.bf16 1065369472, %v1255_v50 }
 0x439   : > { %v1259_v53 = vpop.eup %1258  ;;  %v989_v54 = vadd.bf16 1065369472, %v1257_v51 }
 0x43a   : > { %v1261_v55 = vpop.eup %1260  ;;  %1262 = vrcp.bf16 %v988_v52  ;;  %v990_v56 = vadd.bf16 1065369472, %v1259_v53 }
 0x43b   : > { %1264 = vrcp.bf16 %v989_v54  ;;  %v991_v57 = vadd.bf16 1065369472, %v1261_v55 }
 0x43c   : > { %1266 = vrcp.bf16 %v990_v56 }
 0x43d   : > { %1268 = vrcp.bf16 %v991_v57 }
 0x445   : > { %v1263_v62 = vpop.eup %1262 }
 0x446   : > { %v1265_v58 = vpop.eup %1264  ;;  %v993_v59 = vmul.bf16 1065369472, %v1263_v62 }
 0x447   : > { %v1267_v60 = vpop.eup %1266  ;;  %v995_v61 = vmul.bf16 1065369472, %v1265_v58 }
 0x448   : > { %v1269_v63 = vpop.eup %1268  ;;  %v997_v0 = vmul.bf16 1065369472, %v1267_v60 }
 0x449   : > { %v1140_v1 = vcombine.low %v993_v59, %v995_v61  ;;  %v1141_v2 = vcombine.high %v993_v59, %v995_v61  ;;  %v999_v3 = vmul.bf16 1065369472, %v1269_v63 }
 0x44b   : > { %1020 = vst [vmem:[%s373_s25] sm:$0xff] %v1140_v1  ;;  %1021 = vst [vmem:[%s373_s25 + $0x8] sm:$0xff] %v1141_v2  ;;  %v1142_v4 = vcombine.low %v997_v0, %v999_v3  ;;  %v1143_v5 = vcombine.high %v997_v0, %v999_v3 }
 0x44d   : > { %1022 = vst [vmem:[%s373_s25 + $0x10] sm:$0xff] %v1142_v4  ;;  %1023 = vst [vmem:[%s373_s25 + $0x18] sm:$0xff] %v1143_v5 }
 0x44e PF: > { %s21_s13 = sadd.s32 1, %s1295_s13  }
 0x44f   : > { %p18_p1 = scmp.ge.s32.totalorder %s21_s13, 4  }
 0x451   :  { %20 = sbr.rel (!%p18_p1) target bundleno = 1 (0x1), region = 95 }
 0x458   :  { %1045 = vsyncpa [#allocation3], 1 }
 0x459   :  { %1047 = vsyncpa [#allocation3 + $0x1], 1 }

</bundles_post_ra>
